<compile_context>
chip_gen: v7x
topology: tpu7x:2x2x1
jax: 0.10.0
libtpu: 0.0.40
codegen_flags: <defaults>
</compile_context>

<pallas_src>
import functools

import jax
import jax.numpy as jnp
from jax.experimental import pallas as pl
from jax.experimental.pallas import tpu as pltpu


# ---------------------------------------------------------------------------
# helpers
# ---------------------------------------------------------------------------
def _round_up(n, m):
    return ((n + m - 1) // m) * m


def _choose_batch_tile(batch, row_align):
    """Pick (tb, b_pad): minimal pad waste first, then >= 2 grid steps (v7x
    dual-TC sharding via dimension_semantics='parallel'), then largest tile
    (fewer per-step overheads)."""
    b_min = max(_round_up(batch, row_align), row_align)
    if b_min <= 128:
        return b_min, b_min                 # too small to split; latency-bound
    cands = [128, 256, 512]
    if b_min <= 512:
        cands.append(b_min)                 # exact single-tile fit
    best = None
    for tb in cands:
        b_pad = _round_up(b_min, tb)
        steps = b_pad // tb
        key = (b_pad - b_min, 0 if steps >= 2 else 1, -tb)
        if best is None or key < best[0]:
            best = (key, tb, b_pad)
    return best[1], best[2]


# ---------------------------------------------------------------------------
# Fused Pallas kernel: the whole layer stack for one batch tile.
# Matmuls run in bf16 on the MXU with f32 accumulation; bias / ReLU / sigmoid
# epilogue in f32; intermediate activations never leave the core.
# ---------------------------------------------------------------------------
def _fused_dnn_kernel(*refs, logit, compute_dtype):
    # refs = (x_ref, w0, b0, w1, b1, ..., wL, bL, o_ref)
    x_ref = refs[0]
    o_ref = refs[-1]
    wb = refs[1:-1]
    n_layers = len(wb) // 2

    h = x_ref[...].astype(compute_dtype)              # [TB, K0]
    for layer in range(n_layers):
        w = wb[2 * layer][...]                        # [K_pad, N_pad] bf16
        b = wb[2 * layer + 1][...]                    # [1,  N_pad]    f32
        acc = jnp.dot(h, w, preferred_element_type=jnp.float32) + b
        if layer < n_layers - 1:
            h = jnp.maximum(acc, 0.0).astype(compute_dtype)   # hidden: ReLU
        else:
            out = acc if logit else jax.nn.sigmoid(acc)       # final layer
            o_ref[...] = out.astype(o_ref.dtype)


# ---------------------------------------------------------------------------
# Parameter construction (mirrors reset_parameters: xavier_uniform_ weights,
# zero biases).  Weights stored [in, out] (transposed vs torch's Linear).
# ---------------------------------------------------------------------------
def init_dnn_output_params(key, input_size, hidden_size, output_size, num_layers):
    def xavier_uniform(k, fan_in, fan_out):
        limit = jnp.sqrt(6.0 / (fan_in + fan_out))
        return jax.random.uniform(k, (fan_in, fan_out), jnp.float32,
                                  minval=-limit, maxval=limit)

    layers = []
    for layer in range(num_layers):
        k_in = input_size if layer == 0 else hidden_size
        key, sub = jax.random.split(key)
        layers.append((xavier_uniform(sub, k_in, hidden_size),
                       jnp.zeros((hidden_size,), jnp.float32)))

    last_in = hidden_size if num_layers > 0 else input_size
    key, sub = jax.random.split(key)
    layers.append((xavier_uniform(sub, last_in, output_size),
                   jnp.zeros((output_size,), jnp.float32)))
    return {"layers": layers,
            "input_size": input_size,
            "output_size": output_size}


def pack_dnn_output_params(raw, weight_dtype=jnp.bfloat16):
    """One-time packing: bf16 weights, output dims zero-padded to multiples of
    128 (lane-dense).  The FIRST layer's K dim keeps the true input_size so x
    needs no feature padding; later layers' K dims equal the previous padded N
    (padded rows are inert because padded activation lanes are exactly 0)."""
    packed = []
    prev_n_pad = None
    for idx, (w, b) in enumerate(raw["layers"]):
        k_in, k_out = w.shape
        k_pad = k_in if idx == 0 else prev_n_pad
        n_pad = _round_up(k_out, 128)
        w_pad = jnp.zeros((k_pad, n_pad), jnp.float32).at[:k_in, :k_out].set(w)
        b_pad = jnp.zeros((1, n_pad), jnp.float32).at[0, :k_out].set(b)
        packed.append((w_pad.astype(weight_dtype), b_pad))
        prev_n_pad = n_pad
    return {"layers": packed,
            "input_size": raw["input_size"],
            "output_size": raw["output_size"]}


# ---------------------------------------------------------------------------
# Forward pass: one fused pallas_call for the whole network
# ---------------------------------------------------------------------------
def dnn_output_forward(packed, x, logit=False, compute_dtype=jnp.bfloat16):
    layers = packed["layers"]
    output_size = packed["output_size"]

    batch, f_in = x.shape
    assert f_in == packed["input_size"]
    o_pad = layers[-1][0].shape[1]

    itemsize = x.dtype.itemsize
    row_align = 8 if itemsize >= 4 else (16 if itemsize == 2 else 32)
    tb, b_pad = _choose_batch_tile(batch, row_align)
    grid = (b_pad // tb,)

    # Pad only when needed: feature axis never padded; batch axis only when it
    # is not already tile-aligned -> no extra HBM pass over x in the fast path.
    x_in = x if b_pad == batch else jnp.pad(x, ((0, b_pad - batch), (0, 0)))

    resident = pl.Buffered(1)   # constant index_map: fetch once, single buffer
    flat_inputs = [x_in]
    in_specs = [pl.BlockSpec((tb, f_in), lambda i: (i, 0))]
    for (w, b) in layers:
        flat_inputs += [w, b]
        in_specs += [
            pl.BlockSpec(w.shape, lambda i: (0, 0), pipeline_mode=resident),
            pl.BlockSpec(b.shape, lambda i: (0, 0), pipeline_mode=resident),
        ]

    # Explicit scoped-VMEM budget (defaults: 16 MiB v5e / 32 MiB v6e,v7x).
    weight_bytes = sum(int(w.size) * w.dtype.itemsize +
                       int(b.size) * b.dtype.itemsize for (w, b) in layers)
    act_bytes = 2 * tb * f_in * itemsize + 2 * tb * o_pad * itemsize  # dbl-buffered
    widest = max(w.shape[1] for (w, _) in layers)
    scratch_bytes = 6 * tb * widest          # f32 accumulator + bf16 h copies
    vmem_limit = weight_bytes + act_bytes + scratch_bytes + (16 << 20)
    vmem_limit = int(min(max(vmem_limit, 32 << 20), 96 << 20))
    # TODO(synk): if the packed weight stack ever exceeds ~56 MiB (v7x has only
    # 64 MiB VMEM/TC), stream that layer's weights in K/N tiles with
    # pltpu.emit_pipeline instead of keeping everything resident.

    flops = 2 * b_pad * sum(w.shape[0] * w.shape[1] for (w, _) in layers)
    cost = pl.CostEstimate(
        flops=flops,
        transcendentals=0 if logit else b_pad * o_pad,
        bytes_accessed=int(x_in.size) * itemsize + weight_bytes
                       + b_pad * o_pad * itemsize)

    kernel = functools.partial(_fused_dnn_kernel, logit=logit,
                               compute_dtype=compute_dtype)
    out_pad = pl.pallas_call(
        kernel,
        out_shape=jax.ShapeDtypeStruct((b_pad, o_pad), x.dtype),
        grid=grid,
        in_specs=in_specs,
        out_specs=pl.BlockSpec((tb, o_pad), lambda i: (i, 0)),
        compiler_params=pltpu.CompilerParams(
            dimension_semantics=("parallel",),
            vmem_limit_bytes=vmem_limit),
        cost_estimate=cost,
    )(*flat_inputs)

    return out_pad[:batch, :output_size]


# ---------------------------------------------------------------------------
if __name__ == "__main__":
    # Small config consistent with the module's forward semantics.
    batch = 8
    input_size = 32
    hidden_size = 32
    output_size = 16
    num_layers = 2
    logit = False

    key = jax.random.PRNGKey(0)
    key, xkey = jax.random.split(key)
    x = jax.random.normal(xkey, (batch, input_size), dtype=jnp.float32)

    raw_params = init_dnn_output_params(
        key, input_size, hidden_size, output_size, num_layers)
    packed_params = pack_dnn_output_params(raw_params)

    out = dnn_output_forward(packed_params, x, logit=logit)
    out = jax.block_until_ready(out)

    # Pure-JAX f32 reference of the same math (unpadded weights).  Kernel uses
    # bf16 matmul inputs with f32 accumulation, so tolerance is loosened.
    ref = x
    raw_layers = raw_params["layers"]
    for (w, b) in raw_layers[:-1]:
        ref = jnp.maximum(ref @ w + b, 0.0)
    w_out, b_out = raw_layers[-1]
    ref = ref @ w_out + b_out
    if not logit:
        ref = jax.nn.sigmoid(ref)

    assert out.shape == (batch, output_size), out.shape
    assert out.dtype == x.dtype, out.dtype
    assert jnp.allclose(out, ref, atol=2e-2, rtol=2e-2), "mismatch vs reference"

    print("KERNEL_OK")
</pallas_src>

<mosaic_0001>
module attributes {stable_mosaic.version = 11 : i64} {
  func.func @_fused_dnn_kernel(%arg0: i32, %arg1: memref<8x32xf32, #tpu.memory_space<vmem>>, %arg2: memref<32x128xbf16, #tpu.memory_space<vmem>>, %arg3: memref<1x128xf32, #tpu.memory_space<vmem>>, %arg4: memref<128x128xbf16, #tpu.memory_space<vmem>>, %arg5: memref<1x128xf32, #tpu.memory_space<vmem>>, %arg6: memref<128x128xbf16, #tpu.memory_space<vmem>>, %arg7: memref<1x128xf32, #tpu.memory_space<vmem>>, %arg8: memref<8x128xf32, #tpu.memory_space<vmem>>) attributes {dimension_semantics = [#tpu.dimension_semantics<parallel>], iteration_bounds = array<i64: 1>, scalar_prefetch = 0 : i64, scratch_operands = 0 : i64, tpu.core_type = #tpu.core_type<tc>, window_params = [{transform_indices = @transform_0, window_bounds = array<i64: 8, 32>}, {pipeline_mode = #tpu.pipeline_mode<synchronous>, transform_indices = @transform_1, window_bounds = array<i64: 32, 128>}, {pipeline_mode = #tpu.pipeline_mode<synchronous>, transform_indices = @transform_2, window_bounds = array<i64: 1, 128>}, {pipeline_mode = #tpu.pipeline_mode<synchronous>, transform_indices = @transform_3, window_bounds = array<i64: 128, 128>}, {pipeline_mode = #tpu.pipeline_mode<synchronous>, transform_indices = @transform_4, window_bounds = array<i64: 1, 128>}, {pipeline_mode = #tpu.pipeline_mode<synchronous>, transform_indices = @transform_5, window_bounds = array<i64: 128, 128>}, {pipeline_mode = #tpu.pipeline_mode<synchronous>, transform_indices = @transform_6, window_bounds = array<i64: 1, 128>}, {transform_indices = @transform_7, window_bounds = array<i64: 8, 128>}]} {
    %c0 = arith.constant 0 : index
    %c0_0 = arith.constant 0 : index
    %0 = vector.load %arg1[%c0, %c0_0] : memref<8x32xf32, #tpu.memory_space<vmem>>, vector<8x32xf32>
    %1 = arith.truncf %0 : vector<8x32xf32> to vector<8x32xbf16>
    %c0_1 = arith.constant 0 : index
    %c0_2 = arith.constant 0 : index
    %2 = vector.load %arg2[%c0_1, %c0_2] : memref<32x128xbf16, #tpu.memory_space<vmem>>, vector<32x128xbf16>
    %c0_3 = arith.constant 0 : index
    %c0_4 = arith.constant 0 : index
    %3 = vector.load %arg3[%c0_3, %c0_4] : memref<1x128xf32, #tpu.memory_space<vmem>>, vector<1x128xf32>
    %cst = arith.constant dense<0.000000e+00> : vector<8x128xf32>
    %4 = tpu.matmul %1, %2, %cst {dimension_numbers = #tpu.dot_dimension_numbers<[1], [0], [0], [1], [0, 0, 1, 1], [], []>} : vector<8x32xbf16>, vector<32x128xbf16>, vector<8x128xf32> -> vector<8x128xf32>
    %5 = vector.broadcast %3 : vector<1x128xf32> to vector<8x128xf32>
    %6 = arith.addf %4, %5 : vector<8x128xf32>
    %cst_5 = arith.constant 0.000000e+00 : f32
    %7 = vector.broadcast %cst_5 : f32 to vector<8x128xf32>
    %8 = arith.maximumf %6, %7 : vector<8x128xf32>
    %9 = arith.truncf %8 : vector<8x128xf32> to vector<8x128xbf16>
    %c0_6 = arith.constant 0 : index
    %c0_7 = arith.constant 0 : index
    %10 = vector.load %arg4[%c0_6, %c0_7] : memref<128x128xbf16, #tpu.memory_space<vmem>>, vector<128x128xbf16>
    %c0_8 = arith.constant 0 : index
    %c0_9 = arith.constant 0 : index
    %11 = vector.load %arg5[%c0_8, %c0_9] : memref<1x128xf32, #tpu.memory_space<vmem>>, vector<1x128xf32>
    %cst_10 = arith.constant dense<0.000000e+00> : vector<8x128xf32>
    %12 = tpu.matmul %9, %10, %cst_10 {dimension_numbers = #tpu.dot_dimension_numbers<[1], [0], [0], [1], [0, 0, 1, 1], [], []>} : vector<8x128xbf16>, vector<128x128xbf16>, vector<8x128xf32> -> vector<8x128xf32>
    %13 = vector.broadcast %11 : vector<1x128xf32> to vector<8x128xf32>
    %14 = arith.addf %12, %13 : vector<8x128xf32>
    %cst_11 = arith.constant 0.000000e+00 : f32
    %15 = vector.broadcast %cst_11 : f32 to vector<8x128xf32>
    %16 = arith.maximumf %14, %15 : vector<8x128xf32>
    %17 = arith.truncf %16 : vector<8x128xf32> to vector<8x128xbf16>
    %c0_12 = arith.constant 0 : index
    %c0_13 = arith.constant 0 : index
    %18 = vector.load %arg6[%c0_12, %c0_13] : memref<128x128xbf16, #tpu.memory_space<vmem>>, vector<128x128xbf16>
    %c0_14 = arith.constant 0 : index
    %c0_15 = arith.constant 0 : index
    %19 = vector.load %arg7[%c0_14, %c0_15] : memref<1x128xf32, #tpu.memory_space<vmem>>, vector<1x128xf32>
    %cst_16 = arith.constant dense<0.000000e+00> : vector<8x128xf32>
    %20 = tpu.matmul %17, %18, %cst_16 {dimension_numbers = #tpu.dot_dimension_numbers<[1], [0], [0], [1], [0, 0, 1, 1], [], []>} : vector<8x128xbf16>, vector<128x128xbf16>, vector<8x128xf32> -> vector<8x128xf32>
    %21 = vector.broadcast %19 : vector<1x128xf32> to vector<8x128xf32>
    %22 = arith.addf %20, %21 : vector<8x128xf32>
    %23 = arith.negf %22 : vector<8x128xf32>
    %24 = math.exp %23 : vector<8x128xf32>
    %cst_17 = arith.constant 1.000000e+00 : f32
    %25 = vector.broadcast %cst_17 : f32 to vector<8x128xf32>
    %26 = arith.addf %25, %24 : vector<8x128xf32>
    %27 = arith.divf %25, %26 : vector<8x128xf32>
    %c0_18 = arith.constant 0 : index
    %c0_19 = arith.constant 0 : index
    %28 = vector.load %arg8[%c0_18, %c0_19] : memref<8x128xf32, #tpu.memory_space<vmem>>, vector<8x128xf32>
    tpu.vector_store %arg8[%c0_18, %c0_19], %27 {strides = array<i32>} : memref<8x128xf32, #tpu.memory_space<vmem>>, vector<8x128xf32>,
    return
  }
  func.func @transform_0(%arg0: i32) -> (i32, i32) {
    %c0_i32 = arith.constant 0 : i32
    %c0_i32_0 = arith.constant 0 : i32
    return %arg0, %c0_i32 : i32, i32
  }
  func.func @transform_1(%arg0: i32) -> (i32, i32) {
    %c0_i32 = arith.constant 0 : i32
    %c0_i32_0 = arith.constant 0 : i32
    %c0_i32_1 = arith.constant 0 : i32
    return %c0_i32, %c0_i32_0 : i32, i32
  }
  func.func @transform_2(%arg0: i32) -> (i32, i32) {
    %c0_i32 = arith.constant 0 : i32
    %c0_i32_0 = arith.constant 0 : i32
    %c0_i32_1 = arith.constant 0 : i32
    return %c0_i32, %c0_i32_0 : i32, i32
  }
  func.func @transform_3(%arg0: i32) -> (i32, i32) {
    %c0_i32 = arith.constant 0 : i32
    %c0_i32_0 = arith.constant 0 : i32
    %c0_i32_1 = arith.constant 0 : i32
    return %c0_i32, %c0_i32_0 : i32, i32
  }
  func.func @transform_4(%arg0: i32) -> (i32, i32) {
    %c0_i32 = arith.constant 0 : i32
    %c0_i32_0 = arith.constant 0 : i32
    %c0_i32_1 = arith.constant 0 : i32
    return %c0_i32, %c0_i32_0 : i32, i32
  }
  func.func @transform_5(%arg0: i32) -> (i32, i32) {
    %c0_i32 = arith.constant 0 : i32
    %c0_i32_0 = arith.constant 0 : i32
    %c0_i32_1 = arith.constant 0 : i32
    return %c0_i32, %c0_i32_0 : i32, i32
  }
  func.func @transform_6(%arg0: i32) -> (i32, i32) {
    %c0_i32 = arith.constant 0 : i32
    %c0_i32_0 = arith.constant 0 : i32
    %c0_i32_1 = arith.constant 0 : i32
    return %c0_i32, %c0_i32_0 : i32, i32
  }
  func.func @transform_7(%arg0: i32) -> (i32, i32) {
    %c0_i32 = arith.constant 0 : i32
    %c0_i32_0 = arith.constant 0 : i32
    return %arg0, %c0_i32 : i32, i32
  }
}

</mosaic_0001>

<bundles_post_ra>
// kernel: tpu_custom_call.1
= control target key start
LH: loop header
LB: loop body
LE: loop exit
PB: predicated region body
PF: predicated region fallthrough
CT: control target
= control target key end

     0   :  { %12 = vsyncpa [#allocation3], 0  ;;  %s792_s0 = inlined_call_operand.hbm [shape: f32[8,32], index: 0, kind: input, shape index: {}]   ;;  %s793_s1 = inlined_call_operand.hbm [shape: bf16[32,128], index: 1, kind: input, shape index: {}]   ;;  %s794_s2 = inlined_call_operand.vmem [shape: f32[1,128], index: 2, kind: input, shape index: {}]   ;;  %s795_s3 = inlined_call_operand.hbm [shape: bf16[128,128], index: 3, kind: input, shape index: {}]   ;;  %s796_s4 = inlined_call_operand.vmem [shape: f32[1,128], index: 4, kind: input, shape index: {}]   ;;  %s797_s5 = inlined_call_operand.hbm [shape: bf16[128,128], index: 5, kind: input, shape index: {}]   ;;  %s798_s6 = inlined_call_operand.vmem [shape: f32[1,128], index: 6, kind: input, shape index: {}]   ;;  %s799_s7 = inlined_call_operand.hbm [shape: f32[8,128], index: 7, kind: output, shape index: {}]  }
   0x1   :  { %13 = vsyncpa [#allocation6], 0 }
   0x2   :  { %14 = vsyncpa [#allocation9], 0 }
   0x3   :  { %15 = vsyncpa [#allocation4], 0  ;;  %s641_s24 = smov [#allocation5]   ;;  %s523_s28 = scalar_lea.hbm %s793_s1, 256 }
   0x4   :  { %s31_s25 = sshll.u32 %s641_s24, 4  ;;  %p524_p0 = scmp.ne.s32.totalorder %s793_s1, %s523_s28  ;;  %s32_s25 = int_to_ptr.vmem [resolvable:$true] %s31_s25 }
   0x5   :  { %p527_p1 = scmp.lt.u32.totalorder %s523_s28, %s793_s1 }
   0x7   :  { %p529_p2 = pnand %p527_p1, %p524_p0 }
   0x9   :  { %532 = shalt.err (!%p529_p2)
}
   0xa   :  { %s533_s10 = scalar_lea.vmem %s32_s25, 256  ;;  %p538_p4 = scmp.lt.s32.totalorder %s32_s25, %s32_s25 }
   0xb   :  { %p534_p3 = scmp.ne.s32.totalorder %s32_s25, %s533_s10  ;;  %p539_p5 = scmp.lt.s32.totalorder %s533_s10, %s533_s10 }
   0xd   :  { %p540_p6 = por %p539_p5, %p538_p4 }
   0xf   :  { %p541_p7 = pnand %p540_p6, %p534_p3 }
  0x11   :  { %544 = shalt.err (!%p541_p7)
}
  0x12   :  { %s642_s11 = smov 64   ;;  %s643_s12 = smov 4  }
  0x13   :  { %37 = dma.hbm_to_vmem [thread:$0]  %s793_s1, 256, %s32_s25, [#allocation6], %s642_s11, %s642_s11, %s643_s12  }
  0x14   :  { %s644_s15 = smov [#allocation2]   ;;  %s645_s17 = smov [#allocation7]  }
  0x15   :  { %s22_s16 = sshll.u32 %s644_s15, 4  ;;  %s45_s18 = sshll.u32 %s645_s17, 4  ;;  %s23_s16 = int_to_ptr.vmem [resolvable:$true] %s22_s16  ;;  %s46_s18 = int_to_ptr.vmem [resolvable:$true] %s45_s18 }
  0x16   :  { %s545_s21 = scalar_lea.hbm %s792_s0, 128 }
  0x17   :  { %p546_p8 = scmp.ne.s32.totalorder %s792_s0, %s545_s21  ;;  %p549_p9 = scmp.lt.u32.totalorder %s545_s21, %s792_s0 }
  0x19   :  { %p551_p10 = pnand %p549_p9, %p546_p8 }
  0x1b   :  { %554 = shalt.err (!%p551_p10)
}
  0x1c   :  { %s555_s1 = scalar_lea.vmem %s23_s16, 128  ;;  %p560_p12 = scmp.lt.s32.totalorder %s23_s16, %s23_s16 }
  0x1d   :  { %p556_p11 = scmp.ne.s32.totalorder %s23_s16, %s555_s1  ;;  %p561_p13 = scmp.lt.s32.totalorder %s555_s1, %s555_s1 }
  0x1f   :  { %p562_p0 = por %p561_p13, %p560_p12 }
  0x21   :  { %p563_p1 = pnand %p562_p0, %p556_p11 }
  0x23   :  { %566 = shalt.err (!%p563_p1)
}
  0x24   :  { %25 = dma.hbm_to_vmem [thread:$0]  %s792_s0, 128, %s23_s16, [#allocation3]  }
  0x25   :  { %s567_s30 = scalar_lea.hbm %s795_s3, 1024 }
  0x26   :  { %p568_p2 = scmp.ne.s32.totalorder %s795_s3, %s567_s30  ;;  %p571_p3 = scmp.lt.u32.totalorder %s567_s30, %s795_s3 }
  0x28   :  { %p573_p4 = pnand %p571_p3, %p568_p2 }
  0x2a   :  { %576 = shalt.err (!%p573_p4)
}
  0x2b   :  { %s577_s14 = scalar_lea.vmem %s46_s18, 1024  ;;  %p582_p6 = scmp.lt.s32.totalorder %s46_s18, %s46_s18 }
  0x2c   :  { %p578_p5 = scmp.ne.s32.totalorder %s46_s18, %s577_s14  ;;  %p583_p7 = scmp.lt.s32.totalorder %s577_s14, %s577_s14 }
  0x2e   :  { %p584_p8 = por %p583_p7, %p582_p6 }
  0x30   :  { %p585_p9 = pnand %p584_p8, %p578_p5 }
  0x32   :  { %588 = shalt.err (!%p585_p9)
}
  0x33   :  { %51 = dma.hbm_to_vmem [thread:$0]  %s795_s3, 1024, %s46_s18, [#allocation6], %s642_s11, %s642_s11, %s643_s12  }
  0x34   :  { %s646_s16 = smov [#allocation8]   ;;  %s589_s21 = scalar_lea.hbm %s797_s5, 1024 }
  0x35   :  { %s59_s17 = sshll.u32 %s646_s16, 4  ;;  %p590_p10 = scmp.ne.s32.totalorder %s797_s5, %s589_s21  ;;  %s60_s17 = int_to_ptr.vmem [resolvable:$true] %s59_s17 }
  0x36   :  { %p593_p11 = scmp.lt.u32.totalorder %s589_s21, %s797_s5 }
  0x38   :  { %p595_p12 = pnand %p593_p11, %p590_p10 }
  0x3a   :  { %598 = shalt.err (!%p595_p12)
}
  0x3b   :  { %s599_s1 = scalar_lea.vmem %s60_s17, 1024  ;;  %p604_p0 = scmp.lt.s32.totalorder %s60_s17, %s60_s17 }
  0x3c   :  { %p600_p13 = scmp.ne.s32.totalorder %s60_s17, %s599_s1  ;;  %p605_p1 = scmp.lt.s32.totalorder %s599_s1, %s599_s1 }
  0x3e   :  { %p606_p2 = por %p605_p1, %p604_p0 }
  0x40   :  { %p607_p3 = pnand %p606_p2, %p600_p13 }
  0x42   :  { %610 = shalt.err (!%p607_p3)
}
  0x43   :  { %65 = dma.hbm_to_vmem [thread:$0]  %s797_s5, 1024, %s60_s17, [#allocation9], %s642_s11, %s642_s11, %s643_s12  }
  0x44   :  { %633 = dma.done.wait [#allocation3], 128  }
  0x45   :  { %634 = vsyncadd [#allocation3], 4294967168 }
  0x46   :  { %635 = dma.done.wait [#allocation6], 1280  }
  0x47   :  { %636 = vsyncadd [#allocation6], 4294966016 }
  0x48   :  { %637 = dma.done.wait [#allocation9], 1024  }
  0x49   :  { %638 = vsyncadd [#allocation9], 4294966272  ;;  %v647_v0 = vmov 0.0   ;;  %vm648_vm0 = vmmov 0   ;;  %v501_v1 = vld [vmem:[#allocation5] sm:$0xff]   ;;  %v502_v2 = vld [vmem:[#allocation5 + $0x8] sm:$0xff]  }
  0x4a   :  { %444 = vmatprep.subr.bf16.mxu0 %v647_v0  ;;  %448 = vmatprep.mubr.msk.bf16.mxu0 %vm648_vm0, %v647_v0  ;;  %v81_v3 = vld [vmem:[#allocation2] sm:$0xff]  ;;  %v503_v4 = vld [vmem:[#allocation7] sm:$0xff]   ;;  %vm106_vm1 = vcmask 261120   ;;  %v505_v7 = vld [vmem:[#allocation7 + $0x10] sm:$0xff]  }
  0x4b   :  { %452 = vmatprep.subr.bf16.mxu1 %v647_v0  ;;  %468 = vmatprep.mubr.msk.bf16.mxu1 %vm648_vm0, %v647_v0  ;;  %v82_v5 = vpack.c.bf16 %v81_v3, %v81_v3  ;;  %v504_v6 = vld [vmem:[#allocation7 + $0x8] sm:$0xff]   ;;  %v506_v8 = vld [vmem:[#allocation7 + $0x18] sm:$0xff]   ;;  %v507_v9 = vld [vmem:[#allocation7 + $0x20] sm:$0xff]  }
  0x4c   :  { %445 = vmatpush3.bf16.msra.mxu0 %v501_v1  ;;  %453 = vmatpush3.bf16.msra.mxu1 %v503_v4  ;;  %v508_v10 = vld [vmem:[#allocation7 + $0x28] sm:$0xff]   ;;  %v509_v11 = vld [vmem:[#allocation7 + $0x30] sm:$0xff]   ;;  %v510_v12 = vld [vmem:[#allocation7 + $0x38] sm:$0xff]  }
  0x4d   :  { %446 = vmatprep.subr.bf16.mxu0 %v647_v0  ;;  %454 = vmatprep.subr.bf16.mxu1 %v647_v0  ;;  %v511_v13 = vld [vmem:[#allocation8] sm:$0xff]   ;;  %v512_v14 = vld [vmem:[#allocation8 + $0x8] sm:$0xff]   ;;  %v513_v15 = vld [vmem:[#allocation8 + $0x10] sm:$0xff]  }
  0x4e   :  { %v514_v16 = vld [vmem:[#allocation8 + $0x18] sm:$0xff]   ;;  %v515_v17 = vld [vmem:[#allocation8 + $0x20] sm:$0xff]   ;;  %v516_v18 = vld [vmem:[#allocation8 + $0x28] sm:$0xff]  }
  0x4f   :  { %v400_v19 = vld [vmem:[%s794_s2] ss:$0 sm:$0xff]  ;;  %v517_v27 = vld [vmem:[#allocation8 + $0x30] sm:$0xff]   ;;  %v518_v28 = vld [vmem:[#allocation8 + $0x38] sm:$0xff]  }
  0x50   :  { %447 = vmatpush3.bf16.msra.mxu0 %v502_v2  ;;  %455 = vmatpush3.bf16.msra.mxu1 %v504_v6  ;;  %v404_v29 = vld [vmem:[%s796_s4] ss:$0 sm:$0xff]  ;;  %s649_s4 = smov [#allocation10]  }
  0x51   :  { %472 = vmatprep.subr.bf16.mxu0 %v647_v0  ;;  %456 = vmatprep.subr.bf16.mxu1 %v647_v0  ;;  %v413_v37 = vld [vmem:[%s798_s6] ss:$0 sm:$0xff]  ;;  %s389_s28 = sshll.u32 %s649_s4, 4  ;;  %s390_s28 = int_to_ptr.vmem [resolvable:$true] %s389_s28 }
  0x52   :  { %s611_s29 = scalar_lea.vmem %s390_s28, 128  ;;  %p616_p5 = scmp.lt.s32.totalorder %s390_s28, %s390_s28 }
  0x53   :  { %449 = vmatmul.mubr.msk.bf16.vlgmr.msra.gmra.mrb[0].mxu0 %vm106_vm1, %v82_v5  ;;  %p612_p4 = scmp.ne.s32.totalorder %s390_s28, %s611_s29  ;;  %p617_p6 = scmp.lt.s32.totalorder %s611_s29, %s611_s29 }
  0x54   :  { %488 = vmatprep.mubr.msk.bf16.mxu0 %vm648_vm0, %v647_v0  ;;  %457 = vmatpush3.bf16.msra.mxu1 %v505_v7 }
  0x55   :  { %458 = vmatprep.subr.bf16.mxu1 %v647_v0  ;;  %473 = vmatpush3.bf16.msra.mxu0 %v511_v13  ;;  %p618_p7 = por %p617_p6, %p616_p5 }
  0x56   :  { %474 = vmatprep.subr.bf16.mxu0 %v647_v0 }
  0x57   :  { %p619_p8 = pnand %p618_p7, %p612_p4 }
  0x58   :  { %459 = vmatpush3.bf16.msra.mxu1 %v506_v8 }
  0x59   :  { %460 = vmatprep.subr.bf16.mxu1 %v647_v0  ;;  %475 = vmatpush3.bf16.msra.mxu0 %v512_v14 }
  0x5a   :  { %476 = vmatprep.subr.bf16.mxu0 %v647_v0 }
  0x5c   :  { %461 = vmatpush3.bf16.msra.mxu1 %v507_v9 }
  0x5d   :  { %462 = vmatprep.subr.bf16.mxu1 %v647_v0  ;;  %477 = vmatpush3.bf16.msra.mxu0 %v513_v15 }
  0x5e   :  { %478 = vmatprep.subr.bf16.mxu0 %v647_v0 }
  0x60   :  { %463 = vmatpush3.bf16.msra.mxu1 %v508_v10 }
  0x61   :  { %464 = vmatprep.subr.bf16.mxu1 %v647_v0  ;;  %479 = vmatpush3.bf16.msra.mxu0 %v514_v16 }
  0x62   :  { %480 = vmatprep.subr.bf16.mxu0 %v647_v0 }
  0x64   :  { %465 = vmatpush3.bf16.msra.mxu1 %v509_v11 }
  0x65   :  { %466 = vmatprep.subr.bf16.mxu1 %v647_v0  ;;  %481 = vmatpush3.bf16.msra.mxu0 %v515_v17 }
  0x66   :  { %482 = vmatprep.subr.bf16.mxu0 %v647_v0 }
  0x68   :  { %467 = vmatpush3.bf16.msra.mxu1 %v510_v12 }
  0x69   :  { %483 = vmatpush3.bf16.msra.mxu0 %v516_v18 }
  0x6a   :  { %484 = vmatprep.subr.bf16.mxu0 %v647_v0 }
  0x6d   :  { %485 = vmatpush3.bf16.msra.mxu0 %v517_v27 }
  0x6e   :  { %486 = vmatprep.subr.bf16.mxu0 %v647_v0 }
  0x71   :  { %487 = vmatpush3.bf16.msra.mxu0 %v518_v28 }
 0x126   :  { %v144_v20 = vpop.f32.mrb[0].mxu0 }
 0x127   :  { %v145_v21 = vadd.f32 %v400_v19, %v144_v20  ;;  %v450_v22 = vpop.f32.mrb[1].mxu0 }
 0x128   :  { %v147_v23 = vpop.f32.mrb[2].mxu0 }
 0x129   :  { %v150_v24 = vmax.f32 %v145_v21, 0.0  ;;  %v451_v25 = vpop.f32.mrb[3].mxu0 }
 0x12b   :  { %v151_v26 = vpack.c.bf16 %v150_v24, %v150_v24 }
 0x12d   :  { %469 = vmatmul.mubr.bf16.vlgmr.msra.gmra.mrb[0].mxu1 %v151_v26 }
 0x200   :  { %v257_v30 = vpop.f32.mrb[0].mxu1 }
 0x201   :  { %v258_v31 = vadd.f32 %v404_v29, %v257_v30  ;;  %v470_v32 = vpop.f32.mrb[1].mxu1 }
 0x202   :  { %v260_v33 = vpop.f32.mrb[2].mxu1 }
 0x203   :  { %v263_v34 = vmax.f32 %v258_v31, 0.0  ;;  %v471_v35 = vpop.f32.mrb[3].mxu1 }
 0x205   :  { %v264_v36 = vpack.c.bf16 %v263_v34, %v263_v34 }
 0x207   :  { %489 = vmatmul.mubr.bf16.vlgmr.msra.gmra.mrb[4].mxu0 %v264_v36 }
 0x2da   :  { %v370_v38 = vpop.f32.mrb[4].mxu0 }
 0x2db   :  { %v371_v39 = vadd.f32 %v413_v37, %v370_v38  ;;  %v490_v40 = vpop.f32.mrb[5].mxu0 }
 0x2dc   :  { %v373_v41 = vpop.f32.mrb[6].mxu0 }
 0x2dd   :  { %v422_v42 = vmul.f32 -1.442695, %v371_v39  ;;  %v491_v43 = vpop.f32.mrb[7].mxu0 }
 0x2df   :  { %519 = vpow2.f32 %v422_v42 }
 0x2e9   :  { %v520_v44 = vpop.eup %519 }
 0x2ea   :  { %v379_v45 = vadd.f32 1.0, %v520_v44 }
 0x2ec   :  { %521 = vrcp.f32 %v379_v45 }
 0x2f6   :  { %v522_v46 = vpop.eup %521 }
 0x2f7   :  { %382 = vst [vmem:[#allocation10] sm:$0xff] %v522_v46 }
 0x2f8   :  { %622 = shalt.err (!%p619_p8)
}
 0x2f9   :  { %s623_s8 = scalar_lea.hbm %s799_s7, 128 }
 0x2fa   :  { %p624_p9 = scmp.ne.s32.totalorder %s799_s7, %s623_s8  ;;  %p627_p10 = scmp.lt.u32.totalorder %s623_s8, %s799_s7 }
 0x2fc   :  { %p629_p11 = pnand %p627_p10, %p624_p9 }
 0x2fe   :  { %632 = shalt.err (!%p629_p11)
}
 0x2ff   :  { %392 = dma.vmem_to_hbm [thread:$0]  %s390_s28, 128, %s799_s7, [#allocation4]  }
 0x300   :  { %639 = dma.done.wait [#allocation4], 128  }
 0x301   :  { %640 = vsyncadd [#allocation4], 4294967168 }
 0x302   :  { %396 = vsyncpa [#allocation3], 1 }
 0x303   :  { %397 = vsyncpa [#allocation6], 1 }
 0x304   :  { %398 = vsyncpa [#allocation9], 1 }
 0x305   :  { %399 = vsyncpa [#allocation4], 1 }

</bundles_post_ra>
